<compile_context>
chip_gen: v6e
topology: v6e:2x2x1
jax: 0.10.0
libtpu: 0.0.40
codegen_flags: <defaults>
</compile_context>

<pallas_src>
import jax
import jax.numpy as jnp
from jax.experimental import pallas as pl
from jax.experimental.pallas import tpu as pltpu


def _round_up(x, m):
    return ((x + m - 1) // m) * m


def _gate_kernel(x_ref, w_ref, b_ref, o_ref):
    """One tile of TM pooled pixels.

    x_ref: (p, TM, p*C)  p pooling sub-rows for TM pooled pixels; lanes = (s, c)
    w_ref: (p*C, E)      1x1-conv weight, column window folded in, pre-scaled 1/(p*p)
    b_ref: (1, E)        conv bias (f32)
    o_ref: (TM, E)       f32 output
    """
    p = x_ref.shape[0]
    # Row-pool: VPU adds over the leading (sub-row) axis, accumulated in f32.
    xs = x_ref[0].astype(jnp.float32)
    for r in range(1, p):
        xs = xs + x_ref[r].astype(jnp.float32)
    # Column-pool + 1x1 conv in one MXU matmul. K = p*C and N = E are the true
    # (unpadded) sizes — the kernel is HBM-bound, so we do not zero-pad to
    # "fill" the MXU.
    y = jnp.dot(xs.astype(x_ref.dtype), w_ref[...],
                preferred_element_type=jnp.float32)
    o_ref[...] = (y + b_ref[...]).astype(o_ref.dtype)


def _pick_tile_m(M, p, pC, itemsize):
    # Largest tile that keeps the x block (p, TM, p*C) around <= 4 MiB (so
    # double-buffering stays far below the 16/32 MiB default scoped-VMEM limits
    # on v5e / v6e / v7x), but split M into >= 2 'parallel' steps so v7x
    # megacore can use both TensorCores even on small problems.
    bytes_per_row = max(1, p * pC * itemsize)
    cap = max(8, ((4 * 1024 * 1024) // bytes_per_row) // 8 * 8)
    cap = min(cap, 2048)
    tm = min(cap, _round_up(pl.cdiv(M, 2), 8))
    return max(tm, 8)


def gate_layer_forward(x_nchw, weight, bias, pool_size,
                       compute_dtype=jnp.bfloat16):
    """x_nchw: (N, C, H, W) f32; weight: (E, C, 1, 1); bias: (E,).

    Returns (N, E, H//p, W//p) f32, matching AvgPool2d(p) -> Conv2d(1x1).
    """
    N, C, H, W = x_nchw.shape
    p = pool_size
    assert H % p == 0 and W % p == 0, "H, W must be divisible by pool_size"
    Hp, Wp = H // p, W // p
    E = weight.shape[0]

    M = N * Hp * Wp          # pooled pixels  (matmul M dim)
    pC = p * C               # column window * channels (matmul K dim)

    # ---- input glue: ONE fused relayout --------------------------------------
    # NCHW -> (r, n, hp, wp, s, c) == (p, M, p*C): a single transpose copy.
    # Putting the pooling sub-row r outermost lets the kernel do the row-pool
    # with VPU adds over a leading axis; wp lands in the sublane (row) dim so
    # no in-kernel reshape is ever needed.
    # TODO(synk): accept NHWC (or this layout) from the upstream op to remove
    # even this single relayout copy.
    xr = x_nchw.astype(compute_dtype).reshape(N, C, Hp, p, Wp, p)
    xr = jnp.transpose(xr, (3, 0, 2, 4, 5, 1))          # (p, N, Hp, Wp, p, C)
    xr = xr.reshape(p, M, pC)

    # ---- fold only the COLUMN window into the weight (p-fold, not p^2) -------
    w2d = weight.reshape(E, C).T.astype(jnp.float32)          # (C, E)
    w_col = jnp.tile(w2d, (p, 1)) * (1.0 / (p * p))           # pre-scale in f32
    w_col = w_col.astype(compute_dtype)                        # (p*C, E)
    b_row = bias.reshape(1, E).astype(jnp.float32)

    TM = _pick_tile_m(M, p, pC, jnp.dtype(compute_dtype).itemsize)
    grid_m = pl.cdiv(M, TM)      # partial last block handled by Pallas (no M pad)

    out = pl.pallas_call(
        _gate_kernel,
        out_shape=jax.ShapeDtypeStruct((M, E), jnp.float32),  # true E: no padded writeback
        grid=(grid_m,),
        in_specs=[
            pl.BlockSpec((p, TM, pC), lambda i: (0, i, 0)),
            # NOTE: weight / bias are grid-invariant; pipeline_mode=pl.Buffered(1)
            # would halve their VMEM reservation — negligible at these sizes,
            # revisit only if C and E grow large.
            pl.BlockSpec((pC, E), lambda i: (0, 0)),
            pl.BlockSpec((1, E), lambda i: (0, 0)),
        ],
        out_specs=pl.BlockSpec((TM, E), lambda i: (i, 0)),
        compiler_params=pltpu.CompilerParams(
            dimension_semantics=("parallel",),
            vmem_limit_bytes=32 * 1024 * 1024,   # v5e default scoped VMEM is only 16 MiB
        ),
    )(xr, w_col, b_row)

    # ---- output epilogue ------------------------------------------------------
    # Output is already the true (M, E): no slice.  The NCHW transpose below is
    # only to match the PyTorch module's layout.
    # TODO(synk): keep NHWC here if the downstream consumer is fused.
    out = out.reshape(N, Hp, Wp, E)
    return jnp.transpose(out, (0, 3, 1, 2))


def _reference(x_nchw, weight, bias, pool_size):
    """Pure-JAX reference matching PyTorch AvgPool2d + Conv2d(1x1)."""
    N, C, H, W = x_nchw.shape
    p = pool_size
    Hp, Wp = H // p, W // p
    E = weight.shape[0]
    xr = x_nchw.reshape(N, C, Hp, p, Wp, p)
    pooled = xr.mean(axis=(3, 5))                      # (N, C, Hp, Wp)
    w2d = weight.reshape(E, C)
    return jnp.einsum("nchw,ec->nehw", pooled, w2d) + bias[None, :, None, None]


if __name__ == "__main__":
    # Module hyper-parameters (small, consistent with the forward pass)
    embed_dim = 32       # E
    pool_size = 4        # p
    inplanes = 4         # C
    N, H, W = 2, 16, 16  # batch, spatial

    key = jax.random.PRNGKey(0)
    kx, kw, kb = jax.random.split(key, 3)

    x = jax.random.normal(kx, (N, inplanes, H, W), dtype=jnp.float32)

    # Deterministic Conv2d(1x1) parameter init (kaiming-uniform-ish bounds)
    fan_in = inplanes * 1 * 1
    bound = 1.0 / (fan_in ** 0.5)
    weight = jax.random.uniform(kw, (embed_dim, inplanes, 1, 1),
                                minval=-bound, maxval=bound, dtype=jnp.float32)
    bias = jax.random.uniform(kb, (embed_dim,),
                              minval=-bound, maxval=bound, dtype=jnp.float32)

    ref = _reference(x, weight, bias, pool_size)

    fwd_f32 = jax.jit(lambda a, w, b: gate_layer_forward(a, w, b, pool_size, jnp.float32))
    fwd_bf16 = jax.jit(lambda a, w, b: gate_layer_forward(a, w, b, pool_size, jnp.bfloat16))

    out_f32 = jax.block_until_ready(fwd_f32(x, weight, bias))
    assert out_f32.shape == (N, embed_dim, H // pool_size, W // pool_size), out_f32.shape
    assert jnp.allclose(out_f32, ref, atol=1e-5, rtol=1e-5), "f32 mismatch vs reference"

    out_bf16 = jax.block_until_ready(fwd_bf16(x, weight, bias))
    assert out_bf16.shape == (N, embed_dim, H // pool_size, W // pool_size), out_bf16.shape
    assert jnp.allclose(out_bf16, ref, atol=5e-2, rtol=5e-2), "bf16 mismatch vs reference"

    print("KERNEL_OK")
</pallas_src>

<mosaic_0001>
module attributes {stable_mosaic.version = 11 : i64} {
  func.func @_gate_kernel(%arg0: i32, %arg1: memref<4x16x16xf32, #tpu.memory_space<vmem>>, %arg2: memref<16x32xf32, #tpu.memory_space<vmem>>, %arg3: memref<1x32xf32, #tpu.memory_space<vmem>>, %arg4: memref<16x32xf32, #tpu.memory_space<vmem>>) attributes {dimension_semantics = [#tpu.dimension_semantics<parallel>], iteration_bounds = array<i64: 2>, scalar_prefetch = 0 : i64, scratch_operands = 0 : i64, tpu.core_type = #tpu.core_type<tc>, window_params = [{transform_indices = @transform_0, window_bounds = array<i64: 4, 16, 16>}, {pipeline_mode = #tpu.pipeline_mode<synchronous>, transform_indices = @transform_1, window_bounds = array<i64: 16, 32>}, {pipeline_mode = #tpu.pipeline_mode<synchronous>, transform_indices = @transform_2, window_bounds = array<i64: 1, 32>}, {transform_indices = @transform_3, window_bounds = array<i64: 16, 32>}]} {
    %c0 = arith.constant 0 : index
    %c0_0 = arith.constant 0 : index
    %c0_1 = arith.constant 0 : index
    %0 = vector.load %arg1[%c0, %c0_0, %c0_1] : memref<4x16x16xf32, #tpu.memory_space<vmem>>, vector<1x16x16xf32>
    %1 = vector.shape_cast %0 : vector<1x16x16xf32> to vector<16x16xf32>
    %c1 = arith.constant 1 : index
    %c0_2 = arith.constant 0 : index
    %c0_3 = arith.constant 0 : index
    %2 = vector.load %arg1[%c1, %c0_2, %c0_3] : memref<4x16x16xf32, #tpu.memory_space<vmem>>, vector<1x16x16xf32>
    %3 = vector.shape_cast %2 : vector<1x16x16xf32> to vector<16x16xf32>
    %4 = arith.addf %1, %3 : vector<16x16xf32>
    %c2 = arith.constant 2 : index
    %c0_4 = arith.constant 0 : index
    %c0_5 = arith.constant 0 : index
    %5 = vector.load %arg1[%c2, %c0_4, %c0_5] : memref<4x16x16xf32, #tpu.memory_space<vmem>>, vector<1x16x16xf32>
    %6 = vector.shape_cast %5 : vector<1x16x16xf32> to vector<16x16xf32>
    %7 = arith.addf %4, %6 : vector<16x16xf32>
    %c3 = arith.constant 3 : index
    %c0_6 = arith.constant 0 : index
    %c0_7 = arith.constant 0 : index
    %8 = vector.load %arg1[%c3, %c0_6, %c0_7] : memref<4x16x16xf32, #tpu.memory_space<vmem>>, vector<1x16x16xf32>
    %9 = vector.shape_cast %8 : vector<1x16x16xf32> to vector<16x16xf32>
    %10 = arith.addf %7, %9 : vector<16x16xf32>
    %c0_8 = arith.constant 0 : index
    %c0_9 = arith.constant 0 : index
    %11 = vector.load %arg2[%c0_8, %c0_9] : memref<16x32xf32, #tpu.memory_space<vmem>>, vector<16x32xf32>
    %cst = arith.constant dense<0.000000e+00> : vector<16x32xf32>
    %12 = tpu.matmul %10, %11, %cst {dimension_numbers = #tpu.dot_dimension_numbers<[1], [0], [0], [1], [0, 0, 1, 1], [], []>} : vector<16x16xf32>, vector<16x32xf32>, vector<16x32xf32> -> vector<16x32xf32>
    %c0_10 = arith.constant 0 : index
    %c0_11 = arith.constant 0 : index
    %13 = vector.load %arg3[%c0_10, %c0_11] : memref<1x32xf32, #tpu.memory_space<vmem>>, vector<1x32xf32>
    %14 = vector.broadcast %13 : vector<1x32xf32> to vector<16x32xf32>
    %15 = arith.addf %12, %14 : vector<16x32xf32>
    %c0_12 = arith.constant 0 : index
    %c0_13 = arith.constant 0 : index
    %16 = vector.load %arg4[%c0_12, %c0_13] : memref<16x32xf32, #tpu.memory_space<vmem>>, vector<16x32xf32>
    tpu.vector_store %arg4[%c0_12, %c0_13], %15 {strides = array<i32>} : memref<16x32xf32, #tpu.memory_space<vmem>>, vector<16x32xf32>,
    return
  }
  func.func @transform_0(%arg0: i32) -> (i32, i32, i32) {
    %c0_i32 = arith.constant 0 : i32
    %c0_i32_0 = arith.constant 0 : i32
    %c0_i32_1 = arith.constant 0 : i32
    return %c0_i32, %arg0, %c0_i32_0 : i32, i32, i32
  }
  func.func @transform_1(%arg0: i32) -> (i32, i32) {
    %c0_i32 = arith.constant 0 : i32
    %c0_i32_0 = arith.constant 0 : i32
    %c0_i32_1 = arith.constant 0 : i32
    return %c0_i32, %c0_i32_0 : i32, i32
  }
  func.func @transform_2(%arg0: i32) -> (i32, i32) {
    %c0_i32 = arith.constant 0 : i32
    %c0_i32_0 = arith.constant 0 : i32
    %c0_i32_1 = arith.constant 0 : i32
    return %c0_i32, %c0_i32_0 : i32, i32
  }
  func.func @transform_3(%arg0: i32) -> (i32, i32) {
    %c0_i32 = arith.constant 0 : i32
    %c0_i32_0 = arith.constant 0 : i32
    return %arg0, %c0_i32 : i32, i32
  }
}

</mosaic_0001>

<bundles_post_ra>
// kernel: _lambda_.1
= control target key start
LH: loop header
LB: loop body
LE: loop exit
PB: predicated region body
PF: predicated region fallthrough
CT: control target
= control target key end

     0   :  { %8 = vsyncpa [#allocation4], 0  ;;  %s710_s0 = inlined_call_operand.vmem [shape: f32[4,32,16], index: 0, kind: input, shape index: {}]   ;;  %s711_s1 = inlined_call_operand.vmem [shape: f32[16,32], index: 1, kind: input, shape index: {}]   ;;  %s712_s2 = inlined_call_operand.vmem [shape: f32[1,32], index: 2, kind: input, shape index: {}]   ;;  %s713_s3 = inlined_call_operand.hbm [shape: f32[32,32], index: 3, kind: output, shape index: {}]  }
   0x1   :  { %10 = vsyncpa [#allocation4 + $0x1], 0  ;;  %s590_s12 = smov 0   ;;  %s592_s13 = smov 0  }
   0x2   :  { %s594_s14 = smov 0   ;;  %s596_s15 = smov 0  }
   0x3 LB: > { %s427_s16 = sadd.s32 4294967295, %s565_s15   ;;  %s428_s17 = sadd.s32 4294967294, %s565_s15   ;;  %s565_s15 = sphi %s596_s15, %s719_s15   ;;  %s561_s14 = sphi %s594_s14, %s718_s14   ;;  %s557_s13 = sphi %s592_s13, %s717_s13   ;;  %s553_s12 = sphi %s590_s12, %s716_s12  }
   0x4   : > { %s613_s18 = sadd.s32 1, %s565_s15   ;;  %s23_s19 = sadd.s32 1, %s561_s14 }
   0x5   : > { %s20_s20 = ssub.s32 %s565_s15, %s613_s18  ;;  %p30_p0 = scmp.ne.s32.totalorder %s561_s14, %s557_s13 }
   0x6   : > { %p21_p1 = scmp.eq.s32.totalorder %s20_s20, 0  ;;  %p31_p2 = scmp.eq.s32.totalorder %s565_s15, 0 }
   0x7   : > { %p102_p3 = scmp.eq.s32.totalorder %s427_s16, 1  ;;  %p107_p4 = scmp.ne.s32.totalorder %s557_s13, %s553_s12 }
   0x8   : > { %s626_s21 = scalar_select %p21_p1, %s561_s14, %s23_s19  }
   0x9   : > { %p32_p5 = por %p31_p2, %p30_p0  ;;  %p628_p6 = por %p102_p3, %p30_p0 }
   0xa   : > { %p108_p7 = scmp.eq.s32.totalorder %s428_s17, 1  ;;  %p430_p9 = scmp.ge.s32.totalorder %s565_s15, 2 }
   0xc   : > { %p632_p8 = por %p108_p7, %p107_p4  ;;  %130 = sbr.rel (%p430_p9) target bundleno = 25 (0x19), region = 24 }
  0x11   : > { %133 = sbr.rel (!%p32_p5) target bundleno = 25 (0x19), region = 28  ;;  %s135_s24 = sand.u32 (%p32_p5), 1, %s561_s14  }
  0x12   : > { %s451_s25 = sshll.u32 (%p32_p5), %s565_s15, 4  ;;  %s431_s26 = sshll.u32 (%p32_p5), %s135_s24, 6 }
  0x13   : > { %s140_s29 = scalar_lea.vmem (%p32_p5), %s710_s0, %s451_s25  ;;  %s137_s30 = scalar_lea.vmem (%p32_p5), [#allocation2], %s431_s26 }
  0x14   : > { %v183_v0 = vld [vmem:[%s140_s29] sm:$0xff] (%p32_p5)  ;;  %v185_v1 = vld [vmem:[%s140_s29 + $0x8] sm:$0xff] (%p32_p5) }
  0x15   : > { %v187_v2 = vld [vmem:[%s140_s29 + $0x20] sm:$0xff] (%p32_p5)  ;;  %184 = vst [vmem:[%s137_s30] sm:$0xff] (%p32_p5), %v183_v0  ;;  %186 = vst [vmem:[%s137_s30 + $0x8] sm:$0xff] (%p32_p5), %v185_v1  ;;  %v189_v3 = vld [vmem:[%s140_s29 + $0x28] sm:$0xff] (%p32_p5) }
  0x16   : > { %188 = vst [vmem:[%s137_s30 + $0x10] sm:$0xff] %v187_v2  ;;  %v191_v4 = vld [vmem:[%s140_s29 + $0x40] sm:$0xff]  ;;  %v193_v5 = vld [vmem:[%s140_s29 + $0x48] sm:$0xff]  ;;  %190 = vst [vmem:[%s137_s30 + $0x18] sm:$0xff] %v189_v3 }
  0x17   : > { %192 = vst [vmem:[%s137_s30 + $0x20] sm:$0xff] %v191_v4  ;;  %194 = vst [vmem:[%s137_s30 + $0x28] sm:$0xff] %v193_v5  ;;  %v195_v6 = vld [vmem:[%s140_s29 + $0x60] sm:$0xff]  ;;  %v197_v7 = vld [vmem:[%s140_s29 + $0x68] sm:$0xff] }
  0x18   : > { %196 = vst [vmem:[%s137_s30 + $0x30] sm:$0xff] %v195_v6  ;;  %198 = vst [vmem:[%s137_s30 + $0x38] sm:$0xff] %v197_v7 }
  0x19 PF: > { %p434_p10 = scmp.ge.s32.totalorder %s565_s15, 1  ;;  %p203_p11 = scmp.lt.s32.totalorder %s565_s15, 3 }
  0x1b   : > { %p204_p12 = pnand %p434_p10, %p203_p11 }
  0x1c   : > { %s653_s8 = sand.u32 (!%p204_p12), 1, %s557_s13   ;;  %s452_s25 = sshll.u32 (!%p204_p12), %s427_s16, 8 }
  0x1d   : > { %207 = sbr.rel (%p204_p12) target bundleno = 254 (0xfe), region = 66  ;;  %s435_s9 = sshll.u32 (!%p204_p12), %s653_s8, 6 }
  0x1e   : > { %s212_s10 = scalar_lea.vmem (!%p204_p12), [#allocation2], %s435_s9  ;;  %s436_s11 = sshll.u32 (!%p204_p12), %s653_s8, 4 }
  0x1f   : > { %s232_s20 = scalar_lea.vmem (!%p204_p12), [#allocation3], %s436_s11  ;;  %s667_s28 = scalar_lea.hbm (!%p204_p12), %s713_s3, %s452_s25 }
  0x20   : > { %s360_s24 = sshll.u32 (!%p204_p12), %s232_s20, 4  ;;  %s347_s29 = scalar_lea.sflag (!%p204_p12), [#allocation4], %s653_s8  ;;  %s662_s24 = int_to_ptr.vmem [resolvable:$true] %s360_s24 }
  0x21   : > { %s505_s30 = scalar_lea.vmem (!%p204_p12), %s662_s24, 256  ;;  %s567_s16 = smov (!%p204_p12), [#allocation3]  }
  0x22   : > { %v253_v8 = vld [vmem:[%s711_s1 + $0x8] sm:$0xff]  ;;  %v252_v9 = vld [vmem:[%s711_s1] sm:$0xff]  ;;  %v437_v11 = vld [vmem:[%s212_s10 + $0x10] sm:$0xff]  ;;  %vm261_vm0 = vcmask 130048   ;;  %vm343_vm1 = vcmask 261120   ;;  %p506_p13 = scmp.ne.s32.totalorder %s662_s24, %s505_s30  ;;  %s509_s4 = sshll.u32 %s567_s16, 4  ;;  %s510_s4 = int_to_ptr.vmem [resolvable:$false] %s509_s4 }
  0x23   : > { %457 = vmatprep.subr.mxu0 %v253_v8  ;;  %v235_v10 = vld [vmem:[%s212_s10] sm:$0xff]  ;;  %v236_v14 = vld [vmem:[%s212_s10 + $0x8] sm:$0xff]  ;;  %v438_v15 = vld [vmem:[%s212_s10 + $0x18] sm:$0xff]  ;;  %s511_s5 = scalar_lea.vmem %s510_s4, 512  ;;  %p512_p2 = scmp.lt.s32.totalorder %s662_s24, %s510_s4 }
  0x24   : > { %458 = vmatpush3.msra.mxu0 %v253_v8  ;;  %v439_v12 = vld [vmem:[%s212_s10 + $0x20] sm:$0xff]  ;;  %v240_v13 = vadd.f32 %v437_v11, %v235_v10  ;;  %v441_v16 = vld [vmem:[%s212_s10 + $0x30] sm:$0xff]  ;;  %v241_v17 = vadd.f32 %v438_v15, %v236_v14  ;;  %v440_v18 = vld [vmem:[%s212_s10 + $0x28] sm:$0xff]  ;;  %p507_p0 = pnand %p506_p13, %p628_p6  ;;  %p513_p3 = scmp.lt.s32.totalorder %s511_s5, %s505_s30 }
  0x25   : > { %459 = vmatprep.subr.mxu0 %v252_v9  ;;  %v442_v20 = vld [vmem:[%s212_s10 + $0x38] sm:$0xff]  ;;  %v443_v24 = vld [vmem:[%s712_s2] ss:$0 sm:$0xff] }
  0x26   : > { %460 = vmatpush3.msra.mxu0 %v252_v9  ;;  %v245_v19 = vadd.f32 %v439_v12, %v240_v13  ;;  %v246_v21 = vadd.f32 %v440_v18, %v241_v17  ;;  %p508_p1 = pneg %p507_p0  ;;  %p514_p4 = por %p513_p3, %p512_p2 }
  0x28   : > { %v250_v22 = vadd.f32 %v441_v16, %v245_v19  ;;  %v251_v23 = vadd.f32 %v442_v20, %v246_v21  ;;  %p515_p5 = pnand %p514_p4, %p508_p1 }
  0x2a   : > { %461 = vmatprep.mubr.msk.f32.mxu0 %vm261_vm0, %v250_v22 }
  0x2b   : > { %462 = vmatmul.mubr.msk.f32.vlgmr.msra.gmra.mxu0 %vm261_vm0, %v251_v23 }
  0xeb   : > { %v463_v25 = vpop.f32.mrf.mxu0 }
  0xec   : > { %v340_v26 = vadd.f32 %v463_v25, %v443_v24 }
  0xed   : > { %v334_v27 = vpop.f32.mrf.mxu0 }
  0xee   : > { %345 = vst.msk [vmem:[%s232_s20 + $0x8] sm:$0xff] %vm343_vm1, %v340_v26  ;;  %v335_v28 = vadd.f32 %v443_v24, %v334_v27 }
  0xf0   : > { %344 = vst.msk [vmem:[%s232_s20] sm:$0xff] %vm343_vm1, %v335_v28 }
  0xf1   : > { %518 = shalt.err (!%p515_p5)
}
  0xf2   : > { %s519_s6 = scalar_lea.hbm %s667_s28, 256  ;;  %s523_s10 = scalar_lea.hbm %s713_s3, 512 }
  0xf3   : > { %p520_p7 = scmp.ne.s32.totalorder %s667_s28, %s519_s6  ;;  %p524_p12 = scmp.lt.s32.totalorder %s667_s28, %s713_s3 }
  0xf4   : > { %p525_p13 = scmp.lt.s32.totalorder %s523_s10, %s519_s6 }
  0xf5   : > { %p521_p10 = pnand %p520_p7, %p628_p6 }
  0xf6   : > { %p526_p0 = por %p525_p13, %p524_p12 }
  0xf7   : > { %p522_p11 = pneg %p521_p10 }
  0xf9   : > { %p527_p1 = pnand %p526_p0, %p522_p11 }
  0xfb   : > { %530 = shalt.err (!%p527_p1)
}
  0xfc   : > { %s568_s19 = smov 128   ;;  %s569_s20 = smov 8  }
  0xfd   : > { %464 = dma.vmem_to_hbm [thread:$0]  (%p628_p6), %s662_s24, 256, %s667_s28, %s347_s29, %s568_s19, %s568_s19, %s569_s20  }
  0xfe PF: > { %s375_s25 = sand.u32 1, %s553_s12   ;;  %p467_p2 = pnand %p430_p9, %p632_p8 }
  0xff   : > { %s376_s26 = scalar_lea.sflag [#allocation4], %s375_s25 }
 0x100   : > { %p468_p3 = pneg %p467_p2 }
 0x102   : > { %548 = dma.done.wait (%p468_p3), %s376_s26, 256  }
 0x103   : > { %550 = vsyncadd (%p468_p3), %s376_s26, 4294967040  ;;  %p13_p4 = scmp.ge.s32.totalorder %s613_s18, 4   ;;  %s716_s12 = smov %s557_s13 }
 0x104   : > { %s717_s13 = smov %s561_s14  ;;  %s718_s14 = smov %s626_s21 }
 0x105   : > { %s719_s15 = smov %s613_s18  ;;  %15 = sbr.rel (!%p13_p4) target bundleno = 3 (0x3), region = 113 }
 0x10a   :  { %381 = vsyncpa [#allocation4], 1 }
 0x10b   :  { %383 = vsyncpa [#allocation4 + $0x1], 1 }

</bundles_post_ra>
